<compile_context>
chip_gen: v6e
topology: v6e:2x2x1
jax: 0.10.0
libtpu: 0.0.40
codegen_flags: <defaults>
</compile_context>

<pallas_src>
import functools

import jax
import jax.numpy as jnp
from jax import lax
from jax.experimental import pallas as pl
from jax.experimental.pallas import tpu as pltpu


def _round_up(x, m):
    return (x + m - 1) // m * m


def _vmem_capacity_bytes():
    """Generation-aware VMEM capacity (falls back to a conservative 64 MiB)."""
    try:
        cap = int(pltpu.get_tpu_info().vmem_capacity_bytes)
        if cap > 0:
            return cap
    except Exception:
        pass
    return 64 << 20


def _default_tm(vmem_cap):
    # 128 MiB VMEM (v5e/v6e): tm=1024 keeps weight streaming compute-bound.
    # 64 MiB (v7x) or unknown: tm=512 so the dp-wide x/out tiles still fit.
    return 1024 if vmem_cap >= (96 << 20) else 512


def _vmem_need_bytes(tm, tn, dp):
    """VMEM footprint of one grid step (everything double-buffered by the pipeline)."""
    return (2 * tm * dp * 2          # x tile, bf16
            + 2 * dp * tn * 2        # W1 tile, bf16
            + 2 * tn * dp * 2        # W2 tile, bf16
            + 2 * (tn + dp) * 4      # bias tiles, f32
            + 2 * tm * dp * 4)       # output tile (also the f32 accumulator)


def _ffn_kernel(x_ref, w1_ref, b1_ref, w2_ref, b2_ref, o_ref):
    # x_ref:  (tm, dp) bf16 | w1_ref: (dp, tn) bf16 | b1_ref: (1, tn) f32
    # w2_ref: (tn, dp) bf16 | b2_ref: (1, dp) f32   | o_ref:  (tm, dp) f32 (accumulator)
    n = pl.program_id(1)

    @pl.when(n == 0)
    def _():
        o_ref[...] = jnp.zeros_like(o_ref)

    # First linear for this hidden tile (MXU, f32 accumulation) + bias.
    h = jnp.dot(x_ref[...], w1_ref[...], preferred_element_type=jnp.float32)
    h = h + b1_ref[...]
    # Exact erf-based GELU (PyTorch nn.GELU() default), kept in f32.
    h = 0.5 * h * (1.0 + lax.erf(h * 0.7071067811865476))
    # (Dropout: identity in eval mode.)
    # Second linear: accumulate directly into the resident f32 output block (no scratch).
    o_ref[...] += jnp.dot(h.astype(w2_ref.dtype), w2_ref[...],
                          preferred_element_type=jnp.float32)

    @pl.when(n == pl.num_programs(1) - 1)
    def _():
        # bias2 + (eval-mode dropout) + sigmoid, applied in place on the last hidden step.
        o_ref[...] = jax.nn.sigmoid(o_ref[...] + b2_ref[...]).astype(o_ref.dtype)


def prepare_params(w1, b1, w2, b2):
    """One-time weight prep: pad to lane-dense multiples of 128 and cast to bf16.

    Hoisted out of the per-call path so padded weight copies are not re-materialized
    in HBM on every forward call.  Returns padded params plus the chosen hidden tile.
    """
    dim, hidden = w1.shape
    dp = _round_up(dim, 128)
    hp_base = _round_up(hidden, 128)

    vmem_cap = _vmem_capacity_bytes()
    vmem_budget = (vmem_cap * 3) // 4
    tm_default = _default_tm(vmem_cap)

    # Prefer the weight-resident path (tn == full padded hidden): the hidden grid axis
    # collapses to length 1 and W1/W2 are DMA'd from HBM exactly once per call.
    tn = 128
    for cand in [hp_base] + [c for c in (2048, 1024, 512, 256, 128) if c < hp_base]:
        if _vmem_need_bytes(tm_default, cand, dp) <= vmem_budget:
            tn = cand
            break
    hp = _round_up(hidden, tn)

    def pad2(a, rows, cols, dtype):
        a = a.astype(dtype)
        if a.shape == (rows, cols):
            return a  # already aligned: no padded copy needed
        return jnp.zeros((rows, cols), dtype).at[:a.shape[0], :a.shape[1]].set(a)

    w1_p = pad2(w1, dp, hp, jnp.bfloat16)
    w2_p = pad2(w2, hp, dp, jnp.bfloat16)
    b1_p = pad2(b1.reshape(1, -1), 1, hp, jnp.float32)
    b2_p = pad2(b2.reshape(1, -1), 1, dp, jnp.float32)
    return w1_p, b1_p, w2_p, b2_p, tn


@functools.partial(jax.jit, static_argnames=("tn", "tm"))
def feed_forward(x, w1_p, b1_p, w2_p, b2_p, *, tn, tm=None):
    """x: (batch, seq, dim) float32; padded params from prepare_params(). Returns x.shape."""
    batch, seq, dim = x.shape
    dp, hp = w1_p.shape
    M = batch * seq

    vmem_cap = _vmem_capacity_bytes()
    vmem_budget = (vmem_cap * 3) // 4
    tm = tm if tm is not None else _default_tm(vmem_cap)

    tm_eff = min(tm, _round_up(M, 16))
    # Megacore: prefer >= 2 row tiles so the "parallel" axis can shard across both TCs (v7x).
    if _round_up(M, tm_eff) // tm_eff == 1 and tm_eff >= 32:
        tm_eff = _round_up(tm_eff // 2, 16)
    # Never exceed the VMEM budget: shrink the row tile instead of clamping the limit.
    while _vmem_need_bytes(tm_eff, tn, dp) > vmem_budget and tm_eff > 16:
        tm_eff = max(16, _round_up(tm_eff // 2, 16))
    Mp = _round_up(M, tm_eff)

    x2d = x.reshape(M, dim)
    if Mp == M and dp == dim:
        x_p = x2d.astype(jnp.bfloat16)
    else:
        x_p = jnp.zeros((Mp, dp), jnp.bfloat16).at[:M, :dim].set(
            x2d.astype(jnp.bfloat16))

    grid = (Mp // tm_eff, hp // tn)  # reduction (hidden) axis last

    weight_reads = 1 if tn == hp else grid[0]  # resident vs re-streamed per row tile
    cost = pl.CostEstimate(
        flops=4 * Mp * dp * hp,                       # two matmuls
        transcendentals=Mp * hp + Mp * dp,            # erf + sigmoid
        bytes_accessed=(x_p.size * 2
                        + (w1_p.size + w2_p.size) * 2 * weight_reads
                        + (b1_p.size + b2_p.size) * 4
                        + Mp * dp * 4),
    )

    out = pl.pallas_call(
        _ffn_kernel,
        out_shape=jax.ShapeDtypeStruct((Mp, dp), jnp.float32),
        grid_spec=pltpu.PrefetchScalarGridSpec(
            num_scalar_prefetch=0,
            grid=grid,
            in_specs=[
                pl.BlockSpec((tm_eff, dp), lambda i, n: (i, 0)),  # x row tile
                pl.BlockSpec((dp, tn), lambda i, n: (0, n)),      # W1 hidden tile
                pl.BlockSpec((1, tn), lambda i, n: (0, n)),       # b1 hidden tile
                pl.BlockSpec((tn, dp), lambda i, n: (n, 0)),      # W2 hidden tile
                pl.BlockSpec((1, dp), lambda i, n: (0, 0)),       # b2
            ],
            out_specs=pl.BlockSpec((tm_eff, dp), lambda i, n: (i, 0)),
        ),
        compiler_params=pltpu.CompilerParams(
            dimension_semantics=("parallel", "arbitrary"),
            vmem_limit_bytes=int(vmem_budget),
        ),
        cost_estimate=cost,
    )(x_p, w1_p, b1_p, w2_p, b2_p)

    y = out if (Mp == M and dp == dim) else out[:M, :dim]  # no-op slice when unpadded
    return y.reshape(batch, seq, dim).astype(x.dtype)


def init_params(key, dim):
    """Deterministic init mirroring the PyTorch module's _init_weights."""
    hidden = 2 * dim
    k1, k2, k3, k4 = jax.random.split(key, 4)
    # xavier_normal_: std = sqrt(2 / (fan_in + fan_out))
    std1 = (2.0 / (dim + hidden)) ** 0.5
    std2 = (2.0 / (hidden + dim)) ** 0.5
    # Stored as (in_features, out_features) so the kernel computes x @ W.
    w1 = jax.random.normal(k1, (dim, hidden), jnp.float32) * std1
    w2 = jax.random.normal(k2, (hidden, dim), jnp.float32) * std2
    b1 = jax.random.normal(k3, (hidden,), jnp.float32) * 1e-6
    b2 = jax.random.normal(k4, (dim,), jnp.float32) * 1e-6
    return w1, b1, w2, b2


def _reference(x, w1, b1, w2, b2):
    h = x @ w1 + b1
    h = 0.5 * h * (1.0 + lax.erf(h * 0.7071067811865476))
    y = h @ w2 + b2
    return jax.nn.sigmoid(y)


if __name__ == "__main__":
    key = jax.random.PRNGKey(0)
    kx, kp = jax.random.split(key)

    batch, seq, dim = 2, 8, 32
    x = jax.random.normal(kx, (batch, seq, dim), jnp.float32)
    w1, b1, w2, b2 = init_params(kp, dim)

    # One-time weight prep (padding + bf16 cast hoisted out of the per-call path).
    w1_p, b1_p, w2_p, b2_p, tn = prepare_params(w1, b1, w2, b2)

    out = feed_forward(x, w1_p, b1_p, w2_p, b2_p, tn=tn)
    out = jax.block_until_ready(out)

    ref = _reference(x, w1, b1, w2, b2)
    assert out.shape == x.shape
    # bf16 matmul operands (f32 accumulation / f32 epilogue) -> loosened tolerance vs f32 ref.
    assert jnp.allclose(out, ref, atol=2e-2, rtol=2e-2), "mismatch vs reference"

    print("KERNEL_OK")
</pallas_src>

<mosaic_0001>
module attributes {stable_mosaic.version = 11 : i64} {
  func.func @_ffn_kernel(%arg0: i32, %arg1: i32, %arg2: memref<16x128xbf16, #tpu.memory_space<vmem>>, %arg3: memref<128x128xbf16, #tpu.memory_space<vmem>>, %arg4: memref<1x128xf32, #tpu.memory_space<vmem>>, %arg5: memref<128x128xbf16, #tpu.memory_space<vmem>>, %arg6: memref<1x128xf32, #tpu.memory_space<vmem>>, %arg7: memref<16x128xf32, #tpu.memory_space<vmem>>) attributes {dimension_semantics = [#tpu.dimension_semantics<parallel>, #tpu.dimension_semantics<arbitrary>], iteration_bounds = array<i64: 1, 1>, scalar_prefetch = 0 : i64, scratch_operands = 0 : i64, tpu.core_type = #tpu.core_type<tc>, window_params = [{transform_indices = @transform_0, window_bounds = array<i64: 16, 128>}, {transform_indices = @transform_1, window_bounds = array<i64: 128, 128>}, {transform_indices = @transform_2, window_bounds = array<i64: 1, 128>}, {transform_indices = @transform_3, window_bounds = array<i64: 128, 128>}, {pipeline_mode = #tpu.pipeline_mode<synchronous>, transform_indices = @transform_4, window_bounds = array<i64: 1, 128>}, {transform_indices = @transform_5, window_bounds = array<i64: 16, 128>}]} {
    %c0_i32 = arith.constant 0 : i32
    %0 = arith.cmpi eq, %arg1, %c0_i32 : i32
    %1 = arith.extui %0 : i1 to i32
    %c0_i32_0 = arith.constant 0 : i32
    %2 = arith.cmpi ne, %1, %c0_i32_0 : i32
    scf.if %2 {
      %cst_18 = arith.constant 0.000000e+00 : f32
      %26 = vector.broadcast %cst_18 : f32 to vector<16x128xf32>
      %c0_19 = arith.constant 0 : index
      %c0_20 = arith.constant 0 : index
      %27 = vector.load %arg7[%c0_19, %c0_20] : memref<16x128xf32, #tpu.memory_space<vmem>>, vector<16x128xf32>
      tpu.vector_store %arg7[%c0_19, %c0_20], %26 {strides = array<i32>} : memref<16x128xf32, #tpu.memory_space<vmem>>, vector<16x128xf32>,
    } else {
    }
    %c0 = arith.constant 0 : index
    %c0_1 = arith.constant 0 : index
    %3 = vector.load %arg2[%c0, %c0_1] : memref<16x128xbf16, #tpu.memory_space<vmem>>, vector<16x128xbf16>
    %c0_2 = arith.constant 0 : index
    %c0_3 = arith.constant 0 : index
    %4 = vector.load %arg3[%c0_2, %c0_3] : memref<128x128xbf16, #tpu.memory_space<vmem>>, vector<128x128xbf16>
    %cst = arith.constant dense<0.000000e+00> : vector<16x128xf32>
    %5 = tpu.matmul %3, %4, %cst {dimension_numbers = #tpu.dot_dimension_numbers<[1], [0], [0], [1], [0, 0, 1, 1], [], []>} : vector<16x128xbf16>, vector<128x128xbf16>, vector<16x128xf32> -> vector<16x128xf32>
    %c0_4 = arith.constant 0 : index
    %c0_5 = arith.constant 0 : index
    %6 = vector.load %arg4[%c0_4, %c0_5] : memref<1x128xf32, #tpu.memory_space<vmem>>, vector<1x128xf32>
    %7 = vector.broadcast %6 : vector<1x128xf32> to vector<16x128xf32>
    %8 = arith.addf %5, %7 : vector<16x128xf32>
    %cst_6 = arith.constant 5.000000e-01 : f32
    %9 = vector.broadcast %cst_6 : f32 to vector<16x128xf32>
    %10 = arith.mulf %9, %8 : vector<16x128xf32>
    %cst_7 = arith.constant 0.707106769 : f32
    %11 = vector.broadcast %cst_7 : f32 to vector<16x128xf32>
    %12 = arith.mulf %8, %11 : vector<16x128xf32>
    %13 = math.erf %12 : vector<16x128xf32>
    %cst_8 = arith.constant 1.000000e+00 : f32
    %14 = vector.broadcast %cst_8 : f32 to vector<16x128xf32>
    %15 = arith.addf %14, %13 : vector<16x128xf32>
    %16 = arith.mulf %10, %15 : vector<16x128xf32>
    %c0_9 = arith.constant 0 : index
    %c0_10 = arith.constant 0 : index
    %17 = vector.load %arg7[%c0_9, %c0_10] : memref<16x128xf32, #tpu.memory_space<vmem>>, vector<16x128xf32>
    %18 = arith.truncf %16 : vector<16x128xf32> to vector<16x128xbf16>
    %c0_11 = arith.constant 0 : index
    %c0_12 = arith.constant 0 : index
    %19 = vector.load %arg5[%c0_11, %c0_12] : memref<128x128xbf16, #tpu.memory_space<vmem>>, vector<128x128xbf16>
    %cst_13 = arith.constant dense<0.000000e+00> : vector<16x128xf32>
    %20 = tpu.matmul %18, %19, %cst_13 {dimension_numbers = #tpu.dot_dimension_numbers<[1], [0], [0], [1], [0, 0, 1, 1], [], []>} : vector<16x128xbf16>, vector<128x128xbf16>, vector<16x128xf32> -> vector<16x128xf32>
    %21 = arith.addf %17, %20 : vector<16x128xf32>
    %c0_14 = arith.constant 0 : index
    %c0_15 = arith.constant 0 : index
    %22 = vector.load %arg7[%c0_14, %c0_15] : memref<16x128xf32, #tpu.memory_space<vmem>>, vector<16x128xf32>
    tpu.vector_store %arg7[%c0_14, %c0_15], %21 {strides = array<i32>} : memref<16x128xf32, #tpu.memory_space<vmem>>, vector<16x128xf32>,
    %c0_i32_16 = arith.constant 0 : i32
    %23 = arith.cmpi eq, %arg1, %c0_i32_16 : i32
    %24 = arith.extui %23 : i1 to i32
    %c0_i32_17 = arith.constant 0 : i32
    %25 = arith.cmpi ne, %24, %c0_i32_17 : i32
    scf.if %25 {
      %c0_18 = arith.constant 0 : index
      %c0_19 = arith.constant 0 : index
      %26 = vector.load %arg7[%c0_18, %c0_19] : memref<16x128xf32, #tpu.memory_space<vmem>>, vector<16x128xf32>
      %c0_20 = arith.constant 0 : index
      %c0_21 = arith.constant 0 : index
      %27 = vector.load %arg6[%c0_20, %c0_21] : memref<1x128xf32, #tpu.memory_space<vmem>>, vector<1x128xf32>
      %28 = vector.broadcast %27 : vector<1x128xf32> to vector<16x128xf32>
      %29 = arith.addf %26, %28 : vector<16x128xf32>
      %30 = arith.negf %29 : vector<16x128xf32>
      %31 = math.exp %30 : vector<16x128xf32>
      %cst_22 = arith.constant 1.000000e+00 : f32
      %32 = vector.broadcast %cst_22 : f32 to vector<16x128xf32>
      %33 = arith.addf %32, %31 : vector<16x128xf32>
      %34 = arith.divf %32, %33 : vector<16x128xf32>
      %c0_23 = arith.constant 0 : index
      %c0_24 = arith.constant 0 : index
      %35 = vector.load %arg7[%c0_23, %c0_24] : memref<16x128xf32, #tpu.memory_space<vmem>>, vector<16x128xf32>
      tpu.vector_store %arg7[%c0_23, %c0_24], %34 {strides = array<i32>} : memref<16x128xf32, #tpu.memory_space<vmem>>, vector<16x128xf32>,
    } else {
    }
    return
  }
  func.func @transform_0(%arg0: i32, %arg1: i32) -> (i32, i32) {
    %c0_i32 = arith.constant 0 : i32
    %c0_i32_0 = arith.constant 0 : i32
    return %arg0, %c0_i32 : i32, i32
  }
  func.func @transform_1(%arg0: i32, %arg1: i32) -> (i32, i32) {
    %c0_i32 = arith.constant 0 : i32
    %c0_i32_0 = arith.constant 0 : i32
    return %c0_i32, %arg1 : i32, i32
  }
  func.func @transform_2(%arg0: i32, %arg1: i32) -> (i32, i32) {
    %c0_i32 = arith.constant 0 : i32
    %c0_i32_0 = arith.constant 0 : i32
    return %c0_i32, %arg1 : i32, i32
  }
  func.func @transform_3(%arg0: i32, %arg1: i32) -> (i32, i32) {
    %c0_i32 = arith.constant 0 : i32
    %c0_i32_0 = arith.constant 0 : i32
    return %arg1, %c0_i32 : i32, i32
  }
  func.func @transform_4(%arg0: i32, %arg1: i32) -> (i32, i32) {
    %c0_i32 = arith.constant 0 : i32
    %c0_i32_0 = arith.constant 0 : i32
    %c0_i32_1 = arith.constant 0 : i32
    return %c0_i32, %c0_i32_0 : i32, i32
  }
  func.func @transform_5(%arg0: i32, %arg1: i32) -> (i32, i32) {
    %c0_i32 = arith.constant 0 : i32
    %c0_i32_0 = arith.constant 0 : i32
    return %arg0, %c0_i32 : i32, i32
  }
}

</mosaic_0001>

<bundles_post_ra>
// kernel: feed_forward.1
= control target key start
LH: loop header
LB: loop body
LE: loop exit
PB: predicated region body
PF: predicated region fallthrough
CT: control target
= control target key end

     0   :  { %10 = vsyncpa [#allocation3], 0  ;;  %s546_s0 = inlined_call_operand.vmem [shape: bf16[16,128], index: 0, kind: input, shape index: {}]   ;;  %s547_s1 = inlined_call_operand.hbm [shape: bf16[128,128], index: 1, kind: input, shape index: {}]   ;;  %s548_s2 = inlined_call_operand.vmem [shape: f32[1,128], index: 2, kind: input, shape index: {}]   ;;  %s549_s3 = inlined_call_operand.hbm [shape: bf16[128,128], index: 3, kind: input, shape index: {}]   ;;  %s550_s4 = inlined_call_operand.vmem [shape: f32[1,128], index: 4, kind: input, shape index: {}]   ;;  %s551_s5 = inlined_call_operand.vmem [shape: f32[16,128], index: 5, kind: output, shape index: {}]  }
   0x1   :  { %11 = vsyncpa [#allocation5], 0  ;;  %s489_s18 = smov [#allocation2]  }
   0x2   :  { %s19_s19 = sshll.u32 %s489_s18, 4  ;;  %s20_s19 = int_to_ptr.vmem [resolvable:$true] %s19_s19 }
   0x3   :  { %s453_s20 = scalar_lea.vmem %s20_s19, 1024  ;;  %p458_p1 = scmp.lt.s32.totalorder %s20_s19, %s20_s19 }
   0x4   :  { %p454_p0 = scmp.ne.s32.totalorder %s20_s19, %s453_s20  ;;  %p459_p2 = scmp.lt.s32.totalorder %s453_s20, %s453_s20 }
   0x6   :  { %p460_p3 = por %p459_p2, %p458_p1 }
   0x8   :  { %p461_p4 = pnand %p460_p3, %p454_p0 }
   0xa   :  { %464 = shalt.err (!%p461_p4)
}
   0xb   :  { %s490_s21 = smov 64   ;;  %s491_s22 = smov 4  }
   0xc   :  { %25 = dma.hbm_to_vmem [thread:$0]  %s547_s1, 1024, %s20_s19, [#allocation3], %s490_s21, %s490_s21, %s491_s22  }
   0xd   :  { %s492_s25 = smov [#allocation4]  }
   0xe   :  { %s33_s26 = sshll.u32 %s492_s25, 4  ;;  %s34_s26 = int_to_ptr.vmem [resolvable:$true] %s33_s26 }
   0xf   :  { %s473_s27 = scalar_lea.vmem %s34_s26, 1024  ;;  %p478_p6 = scmp.lt.s32.totalorder %s34_s26, %s34_s26 }
  0x10   :  { %p474_p5 = scmp.ne.s32.totalorder %s34_s26, %s473_s27  ;;  %p479_p7 = scmp.lt.s32.totalorder %s473_s27, %s473_s27 }
  0x12   :  { %p480_p8 = por %p479_p7, %p478_p6 }
  0x14   :  { %p481_p9 = pnand %p480_p8, %p474_p5 }
  0x16   :  { %484 = shalt.err (!%p481_p9)
}
  0x17   :  { %39 = dma.hbm_to_vmem [thread:$0]  %s549_s3, 1024, %s34_s26, [#allocation5], %s490_s21, %s490_s21, %s491_s22  }
  0x18   :  { %485 = dma.done.wait [#allocation3], 1024  }
  0x19   :  { %486 = vsyncadd [#allocation3], 4294966272 }
  0x1a   :  { %487 = dma.done.wait [#allocation5], 1024  }
  0x1b   :  { %488 = vsyncadd [#allocation5], 4294966272  ;;  %v493_v0 = vmov 0.0   ;;  %vm494_vm0 = vmmov 0   ;;  %v416_v1 = vld [vmem:[#allocation2 + $0x38] sm:$0xff]   ;;  %v417_v2 = vld [vmem:[#allocation2 + $0x30] sm:$0xff]  }
  0x1c   :  { %370 = vmatprep.subr.bf16.mxu0 %v493_v0  ;;  %386 = vmatprep.mubr.msk.bf16.mxu0 %vm494_vm0, %v493_v0  ;;  %v418_v3 = vld [vmem:[#allocation2 + $0x28] sm:$0xff]   ;;  %v425_v4 = vld [vmem:[#allocation4 + $0x38] sm:$0xff]   ;;  %v419_v5 = vld [vmem:[#allocation2 + $0x20] sm:$0xff]  }
  0x1d   :  { %390 = vmatprep.subr.bf16.mxu1 %v493_v0  ;;  %406 = vmatprep.mubr.msk.bf16.mxu1 %vm494_vm0, %v493_v0  ;;  %v420_v6 = vld [vmem:[#allocation2 + $0x18] sm:$0xff]   ;;  %v421_v7 = vld [vmem:[#allocation2 + $0x10] sm:$0xff]   ;;  %v422_v8 = vld [vmem:[#allocation2 + $0x8] sm:$0xff]  }
  0x1e   :  { %371 = vmatpush3.bf16.msra.mxu0 %v416_v1  ;;  %391 = vmatpush3.bf16.msra.mxu1 %v425_v4  ;;  %v423_v9 = vld [vmem:[#allocation2] sm:$0xff]   ;;  %v426_v11 = vld [vmem:[#allocation4 + $0x30] sm:$0xff]   ;;  %v427_v12 = vld [vmem:[#allocation4 + $0x28] sm:$0xff]  }
  0x1f   :  { %372 = vmatprep.subr.bf16.mxu0 %v493_v0  ;;  %392 = vmatprep.subr.bf16.mxu1 %v493_v0  ;;  %v424_v10 = vld [vmem:[%s546_s0] sm:$0xff]   ;;  %v429_v14 = vld [vmem:[#allocation4 + $0x18] sm:$0xff]   ;;  %v430_v15 = vld [vmem:[#allocation4 + $0x10] sm:$0xff]  }
  0x20   :  { %v428_v13 = vld [vmem:[#allocation4 + $0x20] sm:$0xff]   ;;  %v431_v16 = vld [vmem:[#allocation4 + $0x8] sm:$0xff]  }
  0x21   :  { %v432_v17 = vld [vmem:[#allocation4] sm:$0xff]  }
  0x22   :  { %373 = vmatpush3.bf16.msra.mxu0 %v417_v2  ;;  %393 = vmatpush3.bf16.msra.mxu1 %v426_v11  ;;  %v331_v18 = vld [vmem:[%s548_s2] ss:$0 sm:$0xff] }
  0x23   :  { %374 = vmatprep.subr.bf16.mxu0 %v493_v0  ;;  %394 = vmatprep.subr.bf16.mxu1 %v493_v0  ;;  %v349_v37 = vld [vmem:[%s550_s4] ss:$0 sm:$0xff] }
  0x26   :  { %375 = vmatpush3.bf16.msra.mxu0 %v418_v3  ;;  %395 = vmatpush3.bf16.msra.mxu1 %v427_v12 }
  0x27   :  { %376 = vmatprep.subr.bf16.mxu0 %v493_v0  ;;  %396 = vmatprep.subr.bf16.mxu1 %v493_v0 }
  0x2a   :  { %377 = vmatpush3.bf16.msra.mxu0 %v419_v5  ;;  %397 = vmatpush3.bf16.msra.mxu1 %v428_v13 }
  0x2b   :  { %378 = vmatprep.subr.bf16.mxu0 %v493_v0  ;;  %398 = vmatprep.subr.bf16.mxu1 %v493_v0 }
  0x2e   :  { %379 = vmatpush3.bf16.msra.mxu0 %v420_v6  ;;  %399 = vmatpush3.bf16.msra.mxu1 %v429_v14 }
  0x2f   :  { %380 = vmatprep.subr.bf16.mxu0 %v493_v0  ;;  %400 = vmatprep.subr.bf16.mxu1 %v493_v0 }
  0x32   :  { %381 = vmatpush3.bf16.msra.mxu0 %v421_v7  ;;  %401 = vmatpush3.bf16.msra.mxu1 %v430_v15 }
  0x33   :  { %382 = vmatprep.subr.bf16.mxu0 %v493_v0  ;;  %402 = vmatprep.subr.bf16.mxu1 %v493_v0 }
  0x36   :  { %383 = vmatpush3.bf16.msra.mxu0 %v422_v8  ;;  %403 = vmatpush3.bf16.msra.mxu1 %v431_v16 }
  0x37   :  { %384 = vmatprep.subr.bf16.mxu0 %v493_v0  ;;  %404 = vmatprep.subr.bf16.mxu1 %v493_v0 }
  0x3a   :  { %385 = vmatpush3.bf16.msra.mxu0 %v423_v9  ;;  %405 = vmatpush3.bf16.msra.mxu1 %v432_v17 }
  0x3d   :  { %387 = vmatmul.mubr.bf16.vlgmr.msra.gmra.mxu0 %v424_v10 }
  0xfd   :  { %v168_v19 = vpop.f32.mrf.mxu0 }
  0xfe   :  { %v169_v20 = vadd.f32 %v331_v18, %v168_v19 }
  0xff   :  { %v388_v21 = vpop.f32.mrf.mxu0 }
 0x100   :  { %v177_v22 = vmul.f32 0.70710677, %v169_v20  ;;  %v175_v30 = vmul.f32 0.5, %v169_v20 }
 0x101   :  { %v171_v23 = vpop.f32.mrf.mxu0 }
 0x102   :  { %433 = verf.f32 %v177_v22  ;;  %v172_v24 = vadd.f32 %v331_v18, %v171_v23 }
 0x103   :  { %v389_v25 = vpop.f32.mrf.mxu0 }
 0x104   :  { %v178_v26 = vmul.f32 0.70710677, %v172_v24  ;;  %v176_v31 = vmul.f32 0.5, %v172_v24 }
 0x106   :  { %435 = verf.f32 %v178_v26 }
 0x10f   :  { %v434_v27 = vpop.eup %433 }
 0x110   :  { %v181_v28 = vadd.f32 1.0, %v434_v27 }
 0x112   :  { %v183_v33 = vmul.f32 %v181_v28, %v175_v30 }
 0x113   :  { %v436_v29 = vpop.eup %435 }
 0x114   :  { %v182_v32 = vadd.f32 1.0, %v436_v29 }
 0x116   :  { %v184_v34 = vmul.f32 %v182_v32, %v176_v31 }
 0x118   :  { %v187_v35 = vpack.c.bf16 %v184_v34, %v183_v33 }
 0x11a   :  { %407 = vmatmul.mubr.bf16.vlgmr.msra.gmra.mxu1 %v187_v35 }
 0x1da   :  { %v286_v36 = vpop.f32.mrf.mxu1 }
 0x1db   :  { %v309_v39 = vadd.f32 %v349_v37, %v286_v36 }
 0x1dc   :  { %v408_v38 = vpop.f32.mrf.mxu1 }
 0x1dd   :  { %v350_v41 = vmul.f32 -1.442695, %v309_v39 }
 0x1de   :  { %v289_v40 = vpop.f32.mrf.mxu1 }
 0x1df   :  { %437 = vpow2.f32 %v350_v41  ;;  %v310_v43 = vadd.f32 %v349_v37, %v289_v40 }
 0x1e0   :  { %v409_v42 = vpop.f32.mrf.mxu1 }
 0x1e1   :  { %v351_v44 = vmul.f32 -1.442695, %v310_v43 }
 0x1e3   :  { %439 = vpow2.f32 %v351_v44 }
 0x1ec   :  { %v438_v45 = vpop.eup %437 }
 0x1ed   :  { %v317_v46 = vadd.f32 1.0, %v438_v45 }
 0x1ef   :  { %441 = vrcp.f32 %v317_v46 }
 0x1f0   :  { %v440_v47 = vpop.eup %439 }
 0x1f1   :  { %v318_v48 = vadd.f32 1.0, %v440_v47 }
 0x1f3   :  { %443 = vrcp.f32 %v318_v48 }
 0x1fc   :  { %v442_v49 = vpop.eup %441 }
 0x1fd   :  { %323 = vst [vmem:[%s551_s5] sm:$0xff] %v442_v49 }
 0x200   :  { %v444_v50 = vpop.eup %443 }
 0x201   :  { %324 = vst [vmem:[%s551_s5 + $0x8] sm:$0xff] %v444_v50 }
 0x202   :  { %329 = vsyncpa [#allocation3], 1 }
 0x203   :  { %330 = vsyncpa [#allocation5], 1 }

</bundles_post_ra>
